<compile_context>
chip_gen: v7x
topology: tpu7x:2x2x1
jax: 0.10.0
libtpu: 0.0.40
codegen_flags: <defaults>
</compile_context>

<pallas_src>
import jax
import jax.numpy as jnp
from jax import lax
from jax.experimental import pallas as pl
from jax.experimental.pallas import tpu as pltpu

# Deterministic "parameters" of the emission scorer (synthetic init).
_PROTO_LABEL_BLEND = 0.5   # r: blend weight between support prototype and label reps
_EMISSION_SCALER = 1.0     # learnable scaler in the repo; init to 1.0


def _fused_kernel(test_ref, sup_ref, label_ref, supidx_ref, supmask_ref,
                  tags_ref, mask_ref, emission_ref, lm_ref):
    BB, SL, D = sup_ref.shape
    N = label_ref.shape[1]
    T = test_ref.shape[1]

    def body(i, carry):
        # Post-DMA downcast to bf16 for the MXU operands (VPU work hidden under
        # the DMA); inputs are moved over HBM in their native dtype.
        test = test_ref[i].astype(jnp.bfloat16)            # (T, D)
        sup = sup_ref[i].astype(jnp.bfloat16)              # (SL, D)
        label = label_ref[i].astype(jnp.float32)           # (N, D) consumed as-is
        sidx = supidx_ref[i]                               # (1, SL) int32
        smask = supmask_ref[i]                             # (1, SL) f32

        # Masked one-hot support targets built lane-dense as (N, SL).
        iota_n = lax.broadcasted_iota(jnp.int32, (N, SL), 0)
        onehot_t = jnp.where(iota_n == sidx, smask, 0.0)             # (N, SL) f32

        # proto (N, D) = onehot_T @ sup : standard MXU-native (1,0) contraction,
        # bf16 operands, f32 accumulation; lane axis = D.
        proto_sum = lax.dot_general(
            onehot_t.astype(jnp.bfloat16), sup,
            (((1,), (0,)), ((), ())),
            preferred_element_type=jnp.float32)                      # (N, D)
        counts = jnp.sum(onehot_t, axis=1, keepdims=True)            # (N, 1)
        # Exact reciprocal (approx=False) keeps parity with the reference;
        # approx=True would move it fully to the EUP if VALU ever binds.
        inv = pl.reciprocal(jnp.maximum(counts, 1.0), approx=False)  # (N, 1)
        proto = proto_sum * inv
        # Schema blend with label representations, directly in (N, D).
        proto = (1.0 - _PROTO_LABEL_BLEND) * proto + _PROTO_LABEL_BLEND * label

        # emission^T (N, T) = proto @ test^T : lane axis = T -> lane-dense store.
        emi_t = lax.dot_general(
            proto.astype(jnp.bfloat16), test,
            (((1,), (1,)), ((), ())),
            preferred_element_type=jnp.float32)                      # (N, T)
        emi_t = _EMISSION_SCALER * emi_t
        emission_ref[i] = emi_t.astype(emission_ref.dtype)

        # --- SequenceLabeler loss: masked token-level CE, reduced over the
        # sublane (tag) axis; everything stays (1, T) lane-dense. ---
        tags = jnp.maximum(tags_ref[i] - 1, 0)                       # (1, T)
        mask = mask_ref[i]                                           # (1, T)
        m = jnp.max(emi_t, axis=0, keepdims=True)                    # (1, T)
        lse = jnp.log(jnp.sum(jnp.exp(emi_t - m), axis=0,
                              keepdims=True)) + m                    # (1, T)
        hit = lax.broadcasted_iota(jnp.int32, (N, T), 0) == tags     # (N, T)
        tgt = jnp.sum(jnp.where(hit, emi_t, 0.0), axis=0, keepdims=True)
        ce = (lse - tgt) * mask                                      # (1, T)

        # One merged per-batch partial-sum write: row 0 = loss sum, row 1 = mask sum.
        cm = jnp.concatenate([ce, mask], axis=0)                     # (2, T)
        lm_ref[i] = jnp.sum(cm, axis=-1, keepdims=True)              # (2, 1)
        return carry

    # Partial unroll for larger BB to avoid vreg spills; the kernel is DMA-bound
    # so the rolled-loop scalar overhead hides.
    unroll = True if BB <= 2 else 2
    lax.fori_loop(0, BB, body, 0, unroll=unroll)


def schema_few_shot_seq_labeler_forward(test_reps, test_output_mask,
                                        support_reps, support_output_mask,
                                        test_target, support_target,
                                        label_reps, *, block_b=None):
    """Returns (loss, emission_nt).

    emission_nt is the emission stored transposed as (B, num_tags, T) in bf16
    (lane-dense writeback); transpose outside if a (B, T, num_tags) view is
    needed.  loss matches the torch module's SequenceLabeler forward path.

    Precondition: support_target must be strictly one-hot (the kernel rebuilds
    it in-kernel from argmax indices); soft/multi-hot labels are not supported.
    """
    B, T, D = test_reps.shape
    _, S, L, _ = support_reps.shape
    N = support_target.shape[-1]
    SL = S * L

    # ---- wrapper-side plumbing: reshapes only (no materializing transposes,
    #      no standalone f32->bf16 HBM round-trips) --------------------------
    sup3 = support_reps.reshape(B, SL, D)                               # (B, SL, D)
    sup_idx = jnp.argmax(support_target.reshape(B, SL, N),
                         axis=-1).astype(jnp.int32).reshape(B, 1, SL)   # (B, 1, SL)
    sup_mask = support_output_mask.reshape(B, 1, SL).astype(jnp.float32)
    tags3 = test_target.astype(jnp.int32).reshape(B, 1, T)
    mask3 = test_output_mask.astype(jnp.float32).reshape(B, 1, T)

    # ---- VMEM-budgeted, megacore-aware batch tiling ------------------------
    rep_bytes = jnp.dtype(test_reps.dtype).itemsize
    lbl_bytes = jnp.dtype(label_reps.dtype).itemsize
    per_batch = ((T * D + SL * D) * rep_bytes + N * D * lbl_bytes
                 + (2 * SL + 2 * T) * 4            # idx/mask + tags/mask (f32/int32)
                 + N * T * 2 + 2 * 4)              # bf16 emission + (2,1) partials
    if block_b is None:
        budget = 24 << 20                          # fits v7x 64 MiB / scoped defaults
        bb_vmem = max(1, budget // (2 * per_batch))      # x2: double-buffered pipeline
        target = min(bb_vmem, max(1, B // 4))            # keep >=4 grid steps (megacore)
        block_b = 1
        for cand in range(int(target), 0, -1):
            if B % cand == 0:
                block_b = cand
                break
    assert B % block_b == 0, "block_b must divide the batch size"
    BB = block_b
    G = B // BB
    # Explicit scoped-VMEM limit sized from the double-buffered footprint
    # (v5e default is only 16 MiB); generous headroom, capped for 64 MiB parts.
    vmem_limit = int(max(32 << 20, min(4 * BB * per_batch + (4 << 20), 100 << 20)))
    # Note: on v5e, padding D/T to multiples of 128 in the wrapper would give
    # full-width MXU passes; skipped here since the kernel is memory-bound.

    emission_nt, lm_parts = pl.pallas_call(
        _fused_kernel,
        grid=(G,),
        in_specs=[
            pl.BlockSpec((BB, T, D), lambda g: (g, 0, 0)),
            pl.BlockSpec((BB, SL, D), lambda g: (g, 0, 0)),
            pl.BlockSpec((BB, N, D), lambda g: (g, 0, 0)),
            pl.BlockSpec((BB, 1, SL), lambda g: (g, 0, 0)),
            pl.BlockSpec((BB, 1, SL), lambda g: (g, 0, 0)),
            pl.BlockSpec((BB, 1, T), lambda g: (g, 0, 0)),
            pl.BlockSpec((BB, 1, T), lambda g: (g, 0, 0)),
        ],
        out_specs=[
            pl.BlockSpec((BB, N, T), lambda g: (g, 0, 0)),
            pl.BlockSpec((BB, 2, 1), lambda g: (g, 0, 0)),
        ],
        out_shape=[
            jax.ShapeDtypeStruct((B, N, T), jnp.bfloat16),
            jax.ShapeDtypeStruct((B, 2, 1), jnp.float32),
        ],
        compiler_params=pltpu.CompilerParams(
            dimension_semantics=("parallel",),
            vmem_limit_bytes=vmem_limit),
    )(test_reps, sup3, label_reps, sup_idx, sup_mask, tags3, mask3)

    loss = (jnp.sum(lm_parts[:, 0, 0])
            / jnp.maximum(jnp.sum(lm_parts[:, 1, 0]), 1e-10))
    return loss, emission_nt
    # TODO(synk): CRF/transition-scorer path (Viterbi decode, partition fn) is a
    # data-dependent sequential DP with no clean Pallas expression here.


def _reference(test_reps, test_output_mask, support_reps, support_output_mask,
               test_target, support_target, label_reps):
    """Pure-JAX reference using the same bf16-operand / f32-accumulate scheme."""
    B, T, D = test_reps.shape
    _, S, L, _ = support_reps.shape
    N = support_target.shape[-1]
    SL = S * L
    sup = support_reps.reshape(B, SL, D).astype(jnp.bfloat16)
    test = test_reps.astype(jnp.bfloat16)
    onehot = (support_target.reshape(B, SL, N)
              * support_output_mask.reshape(B, SL, 1)).astype(jnp.float32)
    proto_sum = jnp.einsum("bsn,bsd->bnd", onehot.astype(jnp.bfloat16), sup,
                           preferred_element_type=jnp.float32)       # (B, N, D)
    counts = jnp.sum(onehot, axis=1)[..., None]                      # (B, N, 1)
    proto = proto_sum * (1.0 / jnp.maximum(counts, 1.0))
    proto = ((1.0 - _PROTO_LABEL_BLEND) * proto
             + _PROTO_LABEL_BLEND * label_reps.astype(jnp.float32))
    emission = _EMISSION_SCALER * jnp.einsum(
        "btd,bnd->btn", test, proto.astype(jnp.bfloat16),
        preferred_element_type=jnp.float32)                          # (B, T, N)
    tags = jnp.maximum(test_target - 1, 0)
    lse = jax.scipy.special.logsumexp(emission, axis=-1)
    tgt = jnp.take_along_axis(emission, tags[..., None], axis=-1)[..., 0]
    m = test_output_mask.astype(jnp.float32)
    loss = jnp.sum((lse - tgt) * m) / jnp.maximum(jnp.sum(m), 1e-10)
    return loss, emission


if __name__ == "__main__":
    B, T, S, L, D, N = 2, 8, 2, 8, 32, 8
    key = jax.random.PRNGKey(0)
    k1, k2, k3, k4, k5, k6, k7 = jax.random.split(key, 7)

    test_reps = jax.random.normal(k1, (B, T, D), jnp.float32)
    support_reps = jax.random.normal(k2, (B, S, L, D), jnp.float32)
    label_reps = jax.random.normal(k3, (B, N, D), jnp.float32)
    test_output_mask = (jax.random.uniform(k4, (B, T)) > 0.2).astype(jnp.float32)
    support_output_mask = (jax.random.uniform(k5, (B, S, L)) > 0.2).astype(
        jnp.float32)
    # test_target: 0 = pad tag, 1..N map to emission classes 0..N-1
    test_target = jax.random.randint(k6, (B, T), 0, N + 1, jnp.int32)
    support_target = jax.nn.one_hot(
        jax.random.randint(k7, (B, S, L), 0, N, jnp.int32), N, dtype=jnp.float32)

    loss, emission_nt = schema_few_shot_seq_labeler_forward(
        test_reps, test_output_mask, support_reps, support_output_mask,
        test_target, support_target, label_reps)
    jax.block_until_ready((loss, emission_nt))

    ref_loss, ref_emission = _reference(
        test_reps, test_output_mask, support_reps, support_output_mask,
        test_target, support_target, label_reps)

    # Kernel emission is stored transposed (B, N, T) in bf16 -> compare with
    # bf16-level tolerance after a test-only transpose back to (B, T, N).
    emi = jnp.swapaxes(emission_nt, 1, 2).astype(jnp.float32)
    assert jnp.allclose(emi, ref_emission, atol=2e-2, rtol=2e-2)
    # loss is computed fully in f32 in-kernel (before the bf16 emission downcast).
    assert jnp.allclose(loss, ref_loss, atol=1e-3, rtol=1e-3)

    print("KERNEL_OK")
</pallas_src>

<mosaic_0001>
module attributes {stable_mosaic.version = 11 : i64} {
  func.func @_fused_kernel(%arg0: i32, %arg1: memref<1x8x32xf32, #tpu.memory_space<vmem>>, %arg2: memref<1x16x32xf32, #tpu.memory_space<vmem>>, %arg3: memref<1x8x32xf32, #tpu.memory_space<vmem>>, %arg4: memref<1x1x16xi32, #tpu.memory_space<vmem>>, %arg5: memref<1x1x16xf32, #tpu.memory_space<vmem>>, %arg6: memref<1x1x8xi32, #tpu.memory_space<vmem>>, %arg7: memref<1x1x8xf32, #tpu.memory_space<vmem>>, %arg8: memref<1x8x8xbf16, #tpu.memory_space<vmem>>, %arg9: memref<1x2x1xf32, #tpu.memory_space<vmem>>) attributes {dimension_semantics = [#tpu.dimension_semantics<parallel>], iteration_bounds = array<i64: 2>, scalar_prefetch = 0 : i64, scratch_operands = 0 : i64, tpu.core_type = #tpu.core_type<tc>, window_params = [{transform_indices = @transform_0, window_bounds = array<i64: 1, 8, 32>}, {transform_indices = @transform_1, window_bounds = array<i64: 1, 16, 32>}, {transform_indices = @transform_2, window_bounds = array<i64: 1, 8, 32>}, {transform_indices = @transform_3, window_bounds = array<i64: 1, 1, 16>}, {transform_indices = @transform_4, window_bounds = array<i64: 1, 1, 16>}, {transform_indices = @transform_5, window_bounds = array<i64: 1, 1, 8>}, {transform_indices = @transform_6, window_bounds = array<i64: 1, 1, 8>}, {transform_indices = @transform_7, window_bounds = array<i64: 1, 8, 8>}, {transform_indices = @transform_8, window_bounds = array<i64: 1, 2, 1>}]} {
    %c0_i32 = arith.constant 0 : i32
    %0 = arith.index_cast %c0_i32 : i32 to index
    %c0 = arith.constant 0 : index
    %c0_0 = arith.constant 0 : index
    %1 = vector.load %arg1[%0, %c0, %c0_0] : memref<1x8x32xf32, #tpu.memory_space<vmem>>, vector<1x8x32xf32>
    %2 = vector.shape_cast %1 : vector<1x8x32xf32> to vector<8x32xf32>
    %3 = arith.truncf %2 : vector<8x32xf32> to vector<8x32xbf16>
    %4 = arith.index_cast %c0_i32 : i32 to index
    %c0_1 = arith.constant 0 : index
    %c0_2 = arith.constant 0 : index
    %5 = vector.load %arg2[%4, %c0_1, %c0_2] : memref<1x16x32xf32, #tpu.memory_space<vmem>>, vector<1x16x32xf32>
    %6 = vector.shape_cast %5 : vector<1x16x32xf32> to vector<16x32xf32>
    %7 = arith.truncf %6 : vector<16x32xf32> to vector<16x32xbf16>
    %8 = arith.index_cast %c0_i32 : i32 to index
    %c0_3 = arith.constant 0 : index
    %c0_4 = arith.constant 0 : index
    %9 = vector.load %arg3[%8, %c0_3, %c0_4] : memref<1x8x32xf32, #tpu.memory_space<vmem>>, vector<1x8x32xf32>
    %10 = vector.shape_cast %9 : vector<1x8x32xf32> to vector<8x32xf32>
    %11 = arith.index_cast %c0_i32 : i32 to index
    %c0_5 = arith.constant 0 : index
    %c0_6 = arith.constant 0 : index
    %12 = vector.load %arg4[%11, %c0_5, %c0_6] : memref<1x1x16xi32, #tpu.memory_space<vmem>>, vector<1x1x16xi32>
    %13 = vector.shape_cast %12 : vector<1x1x16xi32> to vector<1x16xi32>
    %14 = arith.index_cast %c0_i32 : i32 to index
    %c0_7 = arith.constant 0 : index
    %c0_8 = arith.constant 0 : index
    %15 = vector.load %arg5[%14, %c0_7, %c0_8] : memref<1x1x16xf32, #tpu.memory_space<vmem>>, vector<1x1x16xf32>
    %16 = vector.shape_cast %15 : vector<1x1x16xf32> to vector<1x16xf32>
    %17 = tpu.iota {dimensions = array<i32: 0>} : vector<8x16xi32>
    %18 = vector.broadcast %13 : vector<1x16xi32> to vector<8x16xi32>
    %19 = arith.cmpi eq, %17, %18 : vector<8x16xi32>
    %cst = arith.constant 0.000000e+00 : f32
    %20 = vector.shape_cast %16 : vector<1x16xf32> to vector<1x16xf32>
    %21 = vector.broadcast %20 : vector<1x16xf32> to vector<8x16xf32>
    %22 = vector.broadcast %cst : f32 to vector<8x16xf32>
    %23 = arith.select %19, %21, %22 : vector<8x16xi1>, vector<8x16xf32>
    %24 = arith.truncf %23 : vector<8x16xf32> to vector<8x16xbf16>
    %cst_9 = arith.constant dense<0.000000e+00> : vector<8x32xf32>
    %25 = tpu.matmul %24, %7, %cst_9 {dimension_numbers = #tpu.dot_dimension_numbers<[1], [0], [0], [1], [0, 0, 1, 1], [], []>} : vector<8x16xbf16>, vector<16x32xbf16>, vector<8x32xf32> -> vector<8x32xf32>
    %cst_10 = arith.constant dense<0.000000e+00> : vector<8xf32>
    %26 = vector.multi_reduction <add>, %23, %cst_10 [1] : vector<8x16xf32> to vector<8xf32>
    %27 = vector.shape_cast %26 : vector<8xf32> to vector<8x1xf32>
    %cst_11 = arith.constant 1.000000e+00 : f32
    %28 = vector.broadcast %cst_11 : f32 to vector<8x1xf32>
    %29 = arith.maximumf %27, %28 : vector<8x1xf32>
    %30 = tpu.reciprocal %29 : vector<8x1xf32> -> vector<8x1xf32>
    %31 = vector.broadcast %30 : vector<8x1xf32> to vector<8x32xf32>
    %32 = arith.mulf %25, %31 : vector<8x32xf32>
    %cst_12 = arith.constant 5.000000e-01 : f32
    %33 = vector.broadcast %cst_12 : f32 to vector<8x32xf32>
    %34 = arith.mulf %33, %32 : vector<8x32xf32>
    %cst_13 = arith.constant 5.000000e-01 : f32
    %35 = vector.broadcast %cst_13 : f32 to vector<8x32xf32>
    %36 = arith.mulf %35, %10 : vector<8x32xf32>
    %37 = arith.addf %34, %36 : vector<8x32xf32>
    %38 = arith.truncf %37 : vector<8x32xf32> to vector<8x32xbf16>
    %cst_14 = arith.constant dense<0.000000e+00> : vector<8x8xf32>
    %39 = tpu.matmul %38, %3, %cst_14 {dimension_numbers = #tpu.dot_dimension_numbers<[1], [1], [0], [0], [0, 0, 1, 0], [], []>} : vector<8x32xbf16>, vector<8x32xbf16>, vector<8x8xf32> -> vector<8x8xf32>
    %cst_15 = arith.constant 1.000000e+00 : f32
    %40 = vector.broadcast %cst_15 : f32 to vector<8x8xf32>
    %41 = arith.mulf %40, %39 : vector<8x8xf32>
    %42 = arith.truncf %41 : vector<8x8xf32> to vector<8x8xbf16>
    %43 = arith.index_cast %c0_i32 : i32 to index
    %c0_16 = arith.constant 0 : index
    %c0_17 = arith.constant 0 : index
    %44 = vector.load %arg8[%43, %c0_16, %c0_17] : memref<1x8x8xbf16, #tpu.memory_space<vmem>>, vector<1x8x8xbf16>
    %45 = vector.shape_cast %44 : vector<1x8x8xbf16> to vector<8x8xbf16>
    %46 = vector.shape_cast %42 : vector<8x8xbf16> to vector<1x8x8xbf16>
    tpu.vector_store %arg8[%43, %c0_16, %c0_17], %46 {strides = array<i32>} : memref<1x8x8xbf16, #tpu.memory_space<vmem>>, vector<1x8x8xbf16>,
    %47 = arith.index_cast %c0_i32 : i32 to index
    %c0_18 = arith.constant 0 : index
    %c0_19 = arith.constant 0 : index
    %48 = vector.load %arg6[%47, %c0_18, %c0_19] : memref<1x1x8xi32, #tpu.memory_space<vmem>>, vector<1x1x8xi32>
    %49 = vector.shape_cast %48 : vector<1x1x8xi32> to vector<1x8xi32>
    %c1_i32 = arith.constant 1 : i32
    %50 = vector.broadcast %c1_i32 : i32 to vector<1x8xi32>
    %51 = arith.subi %49, %50 : vector<1x8xi32>
    %c0_i32_20 = arith.constant 0 : i32
    %52 = vector.broadcast %c0_i32_20 : i32 to vector<1x8xi32>
    %53 = arith.maxsi %51, %52 : vector<1x8xi32>
    %54 = arith.index_cast %c0_i32 : i32 to index
    %c0_21 = arith.constant 0 : index
    %c0_22 = arith.constant 0 : index
    %55 = vector.load %arg7[%54, %c0_21, %c0_22] : memref<1x1x8xf32, #tpu.memory_space<vmem>>, vector<1x1x8xf32>
    %56 = vector.shape_cast %55 : vector<1x1x8xf32> to vector<1x8xf32>
    %cst_23 = arith.constant dense<0xFF800000> : vector<8xf32>
    %57 = vector.multi_reduction <maximumf>, %41, %cst_23 [0] : vector<8x8xf32> to vector<8xf32>
    %58 = vector.shape_cast %57 : vector<8xf32> to vector<1x8xf32>
    %59 = vector.broadcast %58 : vector<1x8xf32> to vector<8x8xf32>
    %60 = arith.subf %41, %59 : vector<8x8xf32>
    %61 = math.exp %60 : vector<8x8xf32>
    %cst_24 = arith.constant dense<0.000000e+00> : vector<8xf32>
    %62 = vector.multi_reduction <add>, %61, %cst_24 [0] : vector<8x8xf32> to vector<8xf32>
    %63 = vector.shape_cast %62 : vector<8xf32> to vector<1x8xf32>
    %64 = math.log %63 : vector<1x8xf32>
    %65 = arith.addf %64, %58 : vector<1x8xf32>
    %66 = tpu.iota {dimensions = array<i32: 0>} : vector<8x8xi32>
    %67 = vector.broadcast %53 : vector<1x8xi32> to vector<8x8xi32>
    %68 = arith.cmpi eq, %66, %67 : vector<8x8xi32>
    %cst_25 = arith.constant 0.000000e+00 : f32
    %69 = vector.broadcast %cst_25 : f32 to vector<8x8xf32>
    %70 = arith.select %68, %41, %69 : vector<8x8xi1>, vector<8x8xf32>
    %cst_26 = arith.constant dense<0.000000e+00> : vector<8xf32>
    %71 = vector.multi_reduction <add>, %70, %cst_26 [0] : vector<8x8xf32> to vector<8xf32>
    %72 = vector.shape_cast %71 : vector<8xf32> to vector<1x8xf32>
    %73 = arith.subf %65, %72 : vector<1x8xf32>
    %74 = arith.mulf %73, %56 : vector<1x8xf32>
    %75 = tpu.concatenate %74, %56 in 0 : vector<1x8xf32>, vector<1x8xf32> -> vector<2x8xf32>
    %cst_27 = arith.constant dense<0.000000e+00> : vector<2xf32>
    %76 = vector.multi_reduction <add>, %75, %cst_27 [1] : vector<2x8xf32> to vector<2xf32>
    %77 = vector.shape_cast %76 : vector<2xf32> to vector<2x1xf32>
    %78 = arith.index_cast %c0_i32 : i32 to index
    %c0_28 = arith.constant 0 : index
    %c0_29 = arith.constant 0 : index
    %79 = vector.load %arg9[%78, %c0_28, %c0_29] : memref<1x2x1xf32, #tpu.memory_space<vmem>>, vector<1x2x1xf32>
    %80 = vector.shape_cast %79 : vector<1x2x1xf32> to vector<2x1xf32>
    %81 = vector.shape_cast %77 : vector<2x1xf32> to vector<1x2x1xf32>
    tpu.vector_store %arg9[%78, %c0_28, %c0_29], %81 {strides = array<i32>} : memref<1x2x1xf32, #tpu.memory_space<vmem>>, vector<1x2x1xf32>,
    %c1_i32_30 = arith.constant 1 : i32
    return
  }
  func.func @transform_0(%arg0: i32) -> (i32, i32, i32) {
    %c0_i32 = arith.constant 0 : i32
    %c0_i32_0 = arith.constant 0 : i32
    %c0_i32_1 = arith.constant 0 : i32
    return %arg0, %c0_i32, %c0_i32_0 : i32, i32, i32
  }
  func.func @transform_1(%arg0: i32) -> (i32, i32, i32) {
    %c0_i32 = arith.constant 0 : i32
    %c0_i32_0 = arith.constant 0 : i32
    %c0_i32_1 = arith.constant 0 : i32
    return %arg0, %c0_i32, %c0_i32_0 : i32, i32, i32
  }
  func.func @transform_2(%arg0: i32) -> (i32, i32, i32) {
    %c0_i32 = arith.constant 0 : i32
    %c0_i32_0 = arith.constant 0 : i32
    %c0_i32_1 = arith.constant 0 : i32
    return %arg0, %c0_i32, %c0_i32_0 : i32, i32, i32
  }
  func.func @transform_3(%arg0: i32) -> (i32, i32, i32) {
    %c0_i32 = arith.constant 0 : i32
    %c0_i32_0 = arith.constant 0 : i32
    %c0_i32_1 = arith.constant 0 : i32
    return %arg0, %c0_i32, %c0_i32_0 : i32, i32, i32
  }
  func.func @transform_4(%arg0: i32) -> (i32, i32, i32) {
    %c0_i32 = arith.constant 0 : i32
    %c0_i32_0 = arith.constant 0 : i32
    %c0_i32_1 = arith.constant 0 : i32
    return %arg0, %c0_i32, %c0_i32_0 : i32, i32, i32
  }
  func.func @transform_5(%arg0: i32) -> (i32, i32, i32) {
    %c0_i32 = arith.constant 0 : i32
    %c0_i32_0 = arith.constant 0 : i32
    %c0_i32_1 = arith.constant 0 : i32
    return %arg0, %c0_i32, %c0_i32_0 : i32, i32, i32
  }
  func.func @transform_6(%arg0: i32) -> (i32, i32, i32) {
    %c0_i32 = arith.constant 0 : i32
    %c0_i32_0 = arith.constant 0 : i32
    %c0_i32_1 = arith.constant 0 : i32
    return %arg0, %c0_i32, %c0_i32_0 : i32, i32, i32
  }
  func.func @transform_7(%arg0: i32) -> (i32, i32, i32) {
    %c0_i32 = arith.constant 0 : i32
    %c0_i32_0 = arith.constant 0 : i32
    %c0_i32_1 = arith.constant 0 : i32
    return %arg0, %c0_i32, %c0_i32_0 : i32, i32, i32
  }
  func.func @transform_8(%arg0: i32) -> (i32, i32, i32) {
    %c0_i32 = arith.constant 0 : i32
    %c0_i32_0 = arith.constant 0 : i32
    %c0_i32_1 = arith.constant 0 : i32
    return %arg0, %c0_i32, %c0_i32_0 : i32, i32, i32
  }
}

</mosaic_0001>

<bundles_post_ra>
// kernel: tpu_custom_call.1
= control target key start
LH: loop header
LB: loop body
LE: loop exit
PB: predicated region body
PF: predicated region fallthrough
CT: control target
= control target key end

     0   :  { %s1432_s0 = inlined_call_operand.hbm [shape: f32[2,8,32], index: 0, kind: input, shape index: {}]   ;;  %s1433_s1 = inlined_call_operand.hbm [shape: f32[2,16,32], index: 1, kind: input, shape index: {}]   ;;  %s1434_s2 = inlined_call_operand.hbm [shape: f32[2,8,32], index: 2, kind: input, shape index: {}]   ;;  %s1435_s3 = inlined_call_operand.vmem [shape: s32[2,1,16], index: 3, kind: input, shape index: {}]   ;;  %s1436_s4 = inlined_call_operand.vmem [shape: f32[2,1,16], index: 4, kind: input, shape index: {}]   ;;  %s1437_s5 = inlined_call_operand.vmem [shape: s32[2,1,8], index: 5, kind: input, shape index: {}]   ;;  %s1438_s6 = inlined_call_operand.vmem [shape: f32[2,1,8], index: 6, kind: input, shape index: {}]   ;;  %s1439_s7 = inlined_call_operand.hbm [shape: bf16[2,8,8], index: 7, kind: output, shape index: {0}]   ;;  %s1440_s8 = inlined_call_operand.vmem [shape: f32[2,2,1], index: 8, kind: output, shape index: {1}]  }
   0x1   :  { %1451 = sst [smem:[#allocation16_spill]] %s1433_s1 }
   0x2   :  { %14 = vsyncpa [#allocation3], 0 }
   0x3   :  { %16 = vsyncpa [#allocation3 + $0x1], 0 }
   0x4   :  { %17 = vsyncpa [#allocation6], 0 }
   0x5   :  { %19 = vsyncpa [#allocation6 + $0x1], 0 }
   0x6   :  { %20 = vsyncpa [#allocation4], 0 }
   0x7   :  { %22 = vsyncpa [#allocation4 + $0x1], 0  ;;  %s1162_s27 = smov 0   ;;  %s1164_s28 = smov 0  }
   0x8   :  { %s1166_s29 = smov 0   ;;  %s1168_s30 = smov 0  }
   0x9 LB: > { %1452 = sst [smem:[#allocation12_spill]] %s1103_s29  ;;  %s1183_s9 = sadd.s32 4294967295, %s1107_s30   ;;  %s1107_s30 = sphi %s1168_s30, %s1474_s30   ;;  %s1103_s29 = sphi %s1166_s29, %s1476_s29   ;;  %s1099_s28 = sphi %s1164_s28, %s1478_s28   ;;  %s1095_s27 = sphi %s1162_s27, %s1477_s27  }
   0xa   : > { %s839_s10 = sadd.s32 4294967294, %s1107_s30   ;;  %s1187_s11 = sadd.s32 1, %s1107_s30  }
   0xb   : > { %1453 = sst [smem:[#allocation13_spill]] %s1187_s11  ;;  %s35_s12 = sadd.s32 1, %s1103_s29 }
   0xc   : > { %s32_s13 = ssub.s32 %s1107_s30, %s1187_s11  ;;  %p42_p0 = scmp.ne.s32.totalorder %s1103_s29, %s1099_s28 }
   0xd   : > { %p33_p1 = scmp.eq.s32.totalorder %s32_s13, 0  ;;  %p43_p2 = scmp.eq.s32.totalorder %s1107_s30, 0 }
   0xe   : > { %p48_p3 = scmp.ne.s32.totalorder %s1099_s28, %s1095_s27  ;;  %p49_p4 = scmp.eq.s32.totalorder %s1183_s9, 0 }
   0xf   : > { %s1199_s14 = scalar_select %p33_p1, %s1103_s29, %s35_s12  }
  0x10   : > { %p44_p5 = por %p43_p2, %p42_p0  ;;  %p1201_p6 = por %p49_p4, %p48_p3 }
  0x11   : > { %1454 = sst [smem:[#allocation14_spill]] %s1199_s14  ;;  %p228_p7 = scmp.eq.s32.totalorder %s1183_s9, 1 }
  0x12   : > { %s1455_s15 = scalar_select %p1201_p6, 1, 0 }
  0x13   : > { %p234_p8 = scmp.eq.s32.totalorder %s839_s10, 1  ;;  %p903_p10 = scmp.lt.s32.totalorder %s1107_s30, 2 }
  0x14   : > { %p1208_p11 = por %p228_p7, %p42_p0  ;;  %s1217_s18 = sand.u32 1, %s1103_s29  }
  0x15   : > { %p1212_p12 = por %p234_p8, %p48_p3  ;;  %p1219_p13 = pnand %p903_p10, %p44_p5 }
  0x16   : > { %s1456_s16 = scalar_select %p1208_p11, 1, 0 }
  0x17   : > { %s1457_s17 = scalar_select %p1212_p12, 1, 0 }
  0x18   : > { %s1459_s19 = scalar_select %p1219_p13, 1, 0 }
  0x19   : > { %1458 = sst [smem:[#allocation15_spill]] %s1457_s17  ;;  %s298_s20 = sand.u32 1, %s1107_s30  }
  0x1a   : > { %s844_s21 = sshll.u32 %s1217_s18, 4  ;;  %s864_s22 = sshll.u32 %s1107_s30, 8 }
  0x1b   : > { %s1460_s1 = sld [smem:[#allocation16_spill]]  ;;  %s302_s26 = scalar_lea.vmem [#allocation5], %s844_s21 }
  0x1c   : > { %s309_s10 = sshll.u32 %s302_s26, 4  ;;  %s1234_s12 = scalar_lea.sflag [#allocation6], %s298_s20  ;;  %s1231_s10 = int_to_ptr.vmem [resolvable:$true] %s309_s10 }
  0x1d   : > { %p1240_p2 = pneg %p1219_p13 }
  0x21   : > { %s1229_s25 = scalar_lea.hbm %s1460_s1, %s864_s22  ;;  %s952_s21 = scalar_lea.hbm %s1460_s1, 512 }
  0x22   : > { %s947_s13 = scalar_lea.hbm %s1229_s25, 256  ;;  %p953_p5 = scmp.lt.u32.totalorder %s1229_s25, %s1460_s1 }
  0x23   : > { %p948_p1 = scmp.ne.s32.totalorder %s1229_s25, %s947_s13  ;;  %p954_p7 = scmp.lt.u32.totalorder %s952_s21, %s947_s13 }
  0x24   : > { %p956_p10 = scmp.lt.u32.totalorder %s947_s13, %s1229_s25 }
  0x25   : > { %p950_p3 = pnand %p1240_p2, %p948_p1  ;;  %p955_p8 = por %p954_p7, %p953_p5 }
  0x27   : > { %p951_p4 = pneg %p950_p3  ;;  %p957_p9 = por %p956_p10, %p955_p8 }
  0x29   : > { %p958_p0 = pnand %p957_p9, %p951_p4 }
  0x2b   : > { %961 = shalt.err (!%p958_p0)
}
  0x2c   : > { %s962_s20 = scalar_lea.vmem %s1231_s10, 256  ;;  %s1109_s22 = smov [#allocation5]  }
  0x2d   : > { %p963_p1 = scmp.ne.s32.totalorder %s1231_s10, %s962_s20  ;;  %s967_s23 = sshll.u32 %s1109_s22, 4  ;;  %s968_s23 = int_to_ptr.vmem [resolvable:$false] %s967_s23 }
  0x2e   : > { %s969_s24 = scalar_lea.vmem %s968_s23, 512  ;;  %p970_p11 = scmp.lt.s32.totalorder %s1231_s10, %s968_s23 }
  0x2f   : > { %p965_p3 = pnand %p963_p1, %p1240_p2  ;;  %p971_p6 = scmp.lt.s32.totalorder %s969_s24, %s962_s20 }
  0x31   : > { %p966_p12 = pneg %p965_p3  ;;  %p972_p5 = por %p971_p6, %p970_p11 }
  0x33   : > { %p973_p7 = pnand %p972_p5, %p966_p12 }
  0x35   : > { %976 = shalt.err (!%p973_p7)
}
  0x36   : > { %s1110_s13 = smov 128   ;;  %s1111_s21 = smov 8  }
  0x37   : > { %895 = dma.hbm_to_vmem [thread:$0]  (!%p1219_p13), %s1229_s25, 256, %s1231_s10, %s1234_s12, %s1110_s13, %s1110_s13, %s1111_s21  }
  0x38   : > { %p359_p9 = scmp.lt.s32.totalorder %s1107_s30, 3  ;;  %s1447_s26 = sshll.u32 %s1217_s18, 3 }
  0x39   : > { %s1446_s20 = sshll.u32 %s1107_s30, 7  ;;  %p1462_p6 = scmp.ge.s32.totalorder %s1107_s30, 1 }
  0x3a   : > { %s1278_s1 = scalar_lea.hbm %s1432_s0, %s1446_s20  ;;  %s284_s25 = scalar_lea.vmem [#allocation2], %s1447_s26 }
  0x3b   : > { %p1269_p11 = pnand %p1462_p6, %p359_p9  ;;  %s291_s10 = sshll.u32 %s284_s25, 4  ;;  %s292_s10 = int_to_ptr.vmem [resolvable:$true] %s291_s10 }
  0x3c   : > { %s281_s13 = scalar_lea.sflag [#allocation3], %s1217_s18  ;;  %s977_s21 = scalar_lea.hbm %s1278_s1, 128 }
  0x3d   : > { %s1463_s22 = scalar_select %p1269_p11, 1, 0 }
  0x3e   : > { %p978_p12 = scmp.ne.s32.totalorder %s1278_s1, %s977_s21  ;;  %s982_s23 = scalar_lea.hbm %s1432_s0, 256 }
  0x3f   : > { %p983_p8 = scmp.lt.u32.totalorder %s1278_s1, %s1432_s0  ;;  %p984_p10 = scmp.lt.u32.totalorder %s982_s23, %s977_s21 }
  0x40   : > { %p980_p0 = pnand %p978_p12, %p1240_p2  ;;  %p986_p3 = scmp.lt.u32.totalorder %s977_s21, %s1278_s1 }
  0x41   : > { %p985_p1 = por %p984_p10, %p983_p8 }
  0x42   : > { %p981_p4 = pneg %p980_p0 }
  0x43   : > { %p987_p5 = por %p986_p3, %p985_p1 }
  0x45   : > { %p988_p7 = pnand %p987_p5, %p981_p4 }
  0x47   : > { %991 = shalt.err (!%p988_p7)
}
  0x48   : > { %s992_s25 = scalar_lea.vmem %s292_s10, 128  ;;  %s1112_s26 = smov [#allocation2]  }
  0x49   : > { %p993_p9 = scmp.ne.s32.totalorder %s292_s10, %s992_s25  ;;  %s997_s17 = sshll.u32 %s1112_s26, 4  ;;  %s998_s17 = int_to_ptr.vmem [resolvable:$false] %s997_s17 }
  0x4a   : > { %s999_s29 = scalar_lea.vmem %s998_s17, 256  ;;  %p1000_p0 = scmp.lt.s32.totalorder %s292_s10, %s998_s17 }
  0x4b   : > { %p995_p6 = pnand %p993_p9, %p1240_p2  ;;  %p1001_p11 = scmp.lt.s32.totalorder %s999_s29, %s992_s25 }
  0x4d   : > { %p996_p12 = pneg %p995_p6  ;;  %p1002_p13 = por %p1001_p11, %p1000_p0 }
  0x4f   : > { %p1003_p8 = pnand %p1002_p13, %p996_p12 }
  0x51   : > { %1006 = shalt.err (!%p1003_p8)
}
  0x52   : > { %p1464_p10 = scmp.ne.s32.totalorder %s1459_s19, 0  ;;  %s1465_s11 = sshll.u32 %s1107_s30, 7 }
  0x53   : > { %s1305_s23 = scalar_lea.hbm %s1434_s2, %s1465_s11  ;;  %s1466_s26 = sshll.u32 %s1217_s18, 3 }
  0x54   : > { %892 = dma.hbm_to_vmem [thread:$0]  (!%p1464_p10), %s1278_s1, 128, %s292_s10, %s281_s13  }
  0x55   : > { %s323_s17 = scalar_lea.vmem [#allocation7], %s1466_s26  ;;  %s1007_s25 = scalar_lea.hbm %s1305_s23, 128 }
  0x56   : > { %s330_s24 = sshll.u32 %s323_s17, 4  ;;  %p1008_p13 = scmp.ne.s32.totalorder %s1305_s23, %s1007_s25  ;;  %s331_s24 = int_to_ptr.vmem [resolvable:$true] %s330_s24 }
  0x57   : > { %s1012_s13 = scalar_lea.hbm %s1434_s2, 256  ;;  %p1013_p1 = scmp.lt.u32.totalorder %s1305_s23, %s1434_s2 }
  0x58   : > { %p1010_p11 = pnand %p1008_p13, %p1240_p2  ;;  %p1014_p3 = scmp.lt.u32.totalorder %s1012_s13, %s1007_s25 }
  0x59   : > { %p1016_p7 = scmp.lt.u32.totalorder %s1007_s25, %s1305_s23 }
  0x5a   : > { %p1011_p4 = pneg %p1010_p11  ;;  %p1015_p5 = por %p1014_p3, %p1013_p1 }
  0x5c   : > { %p1017_p9 = por %p1016_p7, %p1015_p5 }
  0x5e   : > { %p1018_p6 = pnand %p1017_p9, %p1011_p4 }
  0x60   : > { %1021 = shalt.err (!%p1018_p6)
}
  0x61   : > { %s1022_s18 = scalar_lea.vmem %s331_s24, 128  ;;  %s1113_s20 = smov [#allocation7]  }
  0x62   : > { %p1023_p12 = scmp.ne.s32.totalorder %s331_s24, %s1022_s18  ;;  %s1027_s21 = sshll.u32 %s1113_s20, 4  ;;  %s1028_s21 = int_to_ptr.vmem [resolvable:$false] %s1027_s21 }
  0x63   : > { %s1029_s26 = scalar_lea.vmem %s1028_s21, 256  ;;  %p1030_p13 = scmp.lt.s32.totalorder %s331_s24, %s1028_s21 }
  0x64   : > { %p1025_p0 = pnand %p1023_p12, %p1240_p2  ;;  %p1031_p11 = scmp.lt.s32.totalorder %s1029_s26, %s1022_s18 }
  0x66   : > { %p1026_p8 = pneg %p1025_p0  ;;  %p1032_p10 = por %p1031_p11, %p1030_p13 }
  0x68   : > { %p1033_p1 = pnand %p1032_p10, %p1026_p8 }
  0x6a   : > { %1036 = shalt.err (!%p1033_p1)
}
  0x6b   : > { %p1467_p3 = scmp.ne.s32.totalorder %s1459_s19, 0  ;;  %p1468_p4 = scmp.ne.s32.totalorder %s1463_s22, 0 }
  0x6c   : > { %s1330_s14 = sand.u32 (!%p1468_p4), 1, %s1099_s28   ;;  %p1469_p2 = scmp.ne.s32.totalorder (!%p1468_p4), %s1455_s15, 0 }
  0x6d   : > { %898 = dma.hbm_to_vmem [thread:$0]  (!%p1467_p3), %s1305_s23, 128, %s331_s24, %s1234_s12  }
  0x6e   : > { %363 = sbr.rel (%p1468_p4) target bundleno = 768 (0x300), region = 48  ;;  %s850_s17 = sshll.u32 (!%p1468_p4), %s1330_s14, 3 }
  0x6f   : > { %s366_s25 = scalar_lea.sflag (!%p1468_p4), [#allocation3], %s1330_s14  ;;  %s1336_s1 = scalar_lea.vmem (!%p1468_p4), [#allocation2], %s850_s17 }
  0x75   : > { %1082 = dma.done.wait (%p1469_p2), %s366_s25, 128  }
  0x76   : > { %1084 = vsyncadd (%p1469_p2), %s366_s25, 4294967168  ;;  %s374_s19 = sand.u32 1, %s1183_s9   ;;  %s851_s12 = sshll.u32 %s1330_s14, 4 }
  0x77   : > { %s375_s22 = scalar_lea.sflag [#allocation6], %s374_s19  ;;  %s378_s23 = scalar_lea.vmem [#allocation5], %s851_s12 }
  0x78   : > { %1086 = dma.done.wait (%p1469_p2), %s375_s22, 384  }
  0x79   : > { %1088 = vsyncadd (%p1469_p2), %s375_s22, 4294966912  ;;  %p446_p10 = scmp.lt.s32.totalorder %s1183_s9, 1  ;;  %v471_v0 = vlaneseq  ;;  %v1114_v1 = vmov 0.0   ;;  %vm1115_vm0 = vmmov 0   ;;  %v465_v3 = vld [vmem:[%s378_s23] sm:$0xff]  ;;  %v466_v4 = vld [vmem:[%s378_s23 + $0x8] sm:$0xff] }
  0x7a   : > { %869 = vmatprep.subr.bf16.mxu0 %v1114_v1  ;;  %871 = vmatprep.mubr.msk.bf16.mxu0 %vm1115_vm0, %v1114_v1  ;;  %v467_v6 = vpack.c.bf16 %v466_v4, %v465_v3  ;;  %vm486_vm2 = vcmask 130048   ;;  %v463_v11 = vld [vmem:[%s1336_s1] sm:$0xff]  ;;  %vm540_vm3 = vcmask 261120   ;;  %s387_s20 = scalar_lea.vmem [#allocation7], %s850_s17  ;;  %s853_s21 = sshll.u32 %s1330_s14, 2  ;;  %vm595_vm4 = vcmask 64512  }
  0x7b   : > { %s1350_s24 = scalar_select %p446_p10, %s1183_s9, 1  ;;  %875 = vmatprep.subr.bf16.mxu1 %v1114_v1  ;;  %877 = vmatprep.mubr.msk.bf16.mxu1 %vm1115_vm0, %v1114_v1  ;;  %v1356_v2 = vshrl.u32 %v471_v0, 7  ;;  %v464_v12 = vpack.c.bf16 %v463_v11, %v463_v11  ;;  %v468_v17 = vld [vmem:[%s387_s20] sm:$0xff]  ;;  %vm588_vm5 = vcmask 60416   ;;  %vm637_vm8 = vcmask 1040384  }
  0x7c   : > { %870 = vmatpush3.bf16.msra.mxu0 %v467_v6  ;;  %v537_v20 = vmul.f32 0.5, %v468_v17  ;;  %s1370_s26 = scalar_lea.vmem [#allocation8], %s853_s21  ;;  %vm639_vm9 = vcmask 58368   ;;  %s861_s23 = sshll.u32 %s1183_s9, 6 }
  0x7d   : > { %s448_s29 = scalar_lea.vmem %s1435_s3, %s1350_s24  ;;  %s451_s18 = scalar_lea.vmem %s1436_s4, %s1350_s24  ;;  %v545_v13 = vsel %vm540_vm3, %v464_v12, 0  ;;  %v618_v43 = vsub.s32 0, %v1356_v2 }
  0x7e   : > { %v855_v5 = vld [vmem:[%s448_s29] ss:$0 sm:$0xff]  ;;  %876 = vmatpush3.bf16.xpose.msra.mxu1 %v545_v13  ;;  %s454_s1 = scalar_lea.vmem %s1437_s5, %s1350_s24  ;;  %s457_s22 = scalar_lea.vmem %s1438_s6, %s1350_s24 }
  0x7f   : > { %v856_v7 = vld [vmem:[%s451_s18] ss:$0 sm:$0xff]  ;;  %vm477_vm1 = vcmp.eq.s32.totalorder %v1356_v2, %v855_v5  ;;  %s663_s10 = sshll.u32 %s1370_s26, 4  ;;  %s1390_s15 = scalar_lea.hbm %s1439_s7, %s861_s23  ;;  %s664_s10 = int_to_ptr.vmem [resolvable:$true] %s663_s10 }
  0x80   : > { %v484_v8 = vsel %vm477_vm1, %v856_v7, 0.0  ;;  %v590_v37 = vld [vmem:[%s454_s1] sm:$0x1]  ;;  %s646_s11 = scalar_lea.sflag [#allocation4], %s1330_s14  ;;  %s1037_s18 = scalar_lea.vmem %s664_s10, 64 }
  0x81   : > { %v485_v9 = vpack.c.bf16 %v484_v8, %v484_v8  ;;  %v530_v10 = vsel %vm486_vm2, %v484_v8, 0.0  ;;  %v859_v39 = vadd.s32 4294967295, %v590_v37  ;;  %v594_v63 = vld [vmem:[%s457_s22] sm:$0x1]  ;;  %p1038_p5 = scmp.ne.s32.totalorder %s664_s10, %s1037_s18  ;;  %p1470_p7 = scmp.ne.s32.totalorder %s1456_s16, 0 }
  0x82   : > { %531 = vadd.xlane.f32.xlu0 %v530_v10  ;;  %v635_v3 = vrot.slane %v594_v63, %v618_v43  ;;  %s1116_s20 = smov [#allocation8]  }
  0x83   : > { %872 = vmatmul.mubr.msk.bf16.vlgmr.msra.gmra.mrb[0].mxu0 %vm486_vm2, %v485_v9  ;;  %vm592_vm6 = vcmp.gt.s32.totalorder %v859_v39, 0  ;;  %p1039_p9 = pnand %p1038_p5, %p1470_p7  ;;  %s1041_s21 = sshll.u32 %s1116_s20, 4  ;;  %s1042_s21 = int_to_ptr.vmem [resolvable:$false] %s1041_s21 }
  0x84   : > { %v593_v44 = vsel %vm592_vm6, %v859_v39, 0  ;;  %s1043_s17 = scalar_lea.vmem %s1042_s21, 128  ;;  %p1044_p12 = scmp.lt.s32.totalorder %s664_s10, %s1042_s21 }
  0x85   : > { %v619_v45 = vrot.slane %v593_v44, %v618_v43  ;;  %p1040_p6 = pneg %p1039_p9  ;;  %p1045_p0 = scmp.lt.s32.totalorder %s1043_s17, %s1037_s18 }
  0x87   : > { %vm620_vm7 = vcmp.eq.s32.totalorder %v1356_v2, %v619_v45  ;;  %p1046_p8 = por %p1045_p0, %p1044_p12 }
  0x89   : > { %p1047_p13 = pnand %p1046_p8, %p1040_p6 }
 0x10f   : > { %v532_v14 = vpop.xlane.xlu0 %531 }
 0x110   : > { %v533_v15 = vmax.f32 %v532_v14, 1.0 }
 0x112   : > { %941 = vrcp.f32 %v533_v15 }
 0x11c   : > { %v942_v16 = vpop.eup %941 }
 0x156   : > { %v524_v18 = vpop.f32.mrb[0].mxu0 }
 0x157   : > { %v535_v19 = vmul.f32 %v942_v16, %v524_v18  ;;  %v873_v21 = vpop.f32.mrb[1].mxu0 }
 0x158   : > { %v527_v22 = vpop.f32.mrb[2].mxu0 }
 0x159   : > { %v536_v23 = vmul.f32 0.5, %v535_v19  ;;  %v874_v24 = vpop.f32.mrb[3].mxu0 }
 0x15b   : > { %v538_v25 = vadd.f32 %v537_v20, %v536_v23 }
 0x15d   : > { %v539_v26 = vpack.c.bf16 %v538_v25, %v538_v25 }
 0x15f   : > { %878 = vmatmul.mubr.msk.bf16.vlgmr.msra.gmra.mrb[0].mxu1 %vm540_vm3, %v539_v26 }
 0x232   : > { %v581_v27 = vpop.f32.mrb[0].mxu1 }
 0x233   : > { %v587_v28 = vpack.c.bf16 %v581_v27, %v581_v27  ;;  %v596_v29 = vsel %vm595_vm4, %v581_v27, -inf  ;;  %v879_v30 = vpop.f32.mrb[1].mxu1  ;;  %v621_v48 = vsel %vm620_vm7, %v581_v27, 0.0 }
 0x234   : > { %v597_v31 = vrot.slane %v596_v29, 4  ;;  %v584_v32 = vpop.f32.mrb[2].mxu1  ;;  %v622_v51 = vsel %vm595_vm4, %v621_v48, 0.0 }
 0x235   : > { %v880_v33 = vpop.f32.mrb[3].mxu1  ;;  %589 = vst.msk [vmem:[%s1370_s26] sm:$0xf] %vm588_vm5, %v587_v28  ;;  %v623_v53 = vrot.slane %v622_v51, 4 }
 0x236   : > { %v598_v34 = vmax.f32 %v596_v29, %v597_v31 }
 0x237   : > { %v624_v56 = vadd.f32 %v623_v53, %v622_v51 }
 0x238   : > { %v599_v35 = vrot.slane %v598_v34, 2 }
 0x239   : > { %v625_v58 = vrot.slane %v624_v56, 2 }
 0x23a   : > { %v600_v36 = vmax.f32 %v598_v34, %v599_v35 }
 0x23b   : > { %v626_v59 = vadd.f32 %v625_v58, %v624_v56 }
 0x23c   : > { %v601_v38 = vrot.slane %v600_v36, 1 }
 0x23d   : > { %v627_v60 = vrot.slane %v626_v59, 1 }
 0x23e   : > { %v602_v40 = vmax.f32 %v600_v36, %v601_v38 }
 0x23f   : > { %v628_v1 = vadd.f32 %v627_v60, %v626_v59 }
 0x240   : > { %v603_v41 = vsub.f32 %v581_v27, %v602_v40 }
 0x242   : > { %v604_v42 = vmul.f32 1.442695, %v603_v41 }
 0x244   : > { %943 = vpow2.f32 %v604_v42 }
 0x24e   : > { %v944_v46 = vpop.eup %943 }
 0x24f   : > { %v606_v47 = vsel %vm595_vm4, %v944_v46, 0.0 }
 0x250   : > { %v607_v49 = vrot.slane %v606_v47, 4 }
 0x252   : > { %v608_v50 = vadd.f32 %v607_v49, %v606_v47 }
 0x254   : > { %v609_v52 = vrot.slane %v608_v50, 2 }
 0x256   : > { %v610_v54 = vadd.f32 %v609_v52, %v608_v50 }
 0x258   : > { %v611_v55 = vrot.slane %v610_v54, 1 }
 0x25a   : > { %v612_v57 = vadd.f32 %v611_v55, %v610_v54 }
 0x25c   : > { %945 = vlog2.f32 %v612_v57 }
 0x266   : > { %v946_v61 = vpop.eup %945 }
 0x267   : > { %v614_v62 = vmul.f32 0.6931472, %v946_v61 }
 0x269   : > { %v615_v0 = vadd.f32 %v614_v62, %v602_v40 }
 0x26b   : > { %v629_v2 = vsub.f32 %v615_v0, %v628_v1 }
 0x26d   : > { %v630_v4 = vmul.f32 %v629_v2, %v594_v63 }
 0x26f   : > { %v638_v5 = vsel %vm637_vm8, %v630_v4, %v635_v3 }
 0x270   : > { %v640_v6 = vsel %vm639_vm9, %v638_v5, 0.0 }
 0x271   : > { %641 = vadd.xlane.f32.xlu0 %v640_v6 }
 0x272   : > { %1050 = shalt.err (!%p1047_p13)
}
 0x273   : > { %s1051_s9 = scalar_lea.hbm %s1390_s15, 64  ;;  %s1055_s25 = scalar_lea.hbm %s1439_s7, 128 }
 0x274   : > { %p1052_p11 = scmp.ne.s32.totalorder %s1390_s15, %s1051_s9  ;;  %p1056_p4 = scmp.lt.u32.totalorder %s1390_s15, %s1439_s7 }
 0x275   : > { %p1057_p2 = scmp.lt.u32.totalorder %s1055_s25, %s1051_s9  ;;  %p1059_p5 = scmp.lt.u32.totalorder %s1051_s9, %s1390_s15 }
 0x276   : > { %p1053_p1 = pnand %p1052_p11, %p1470_p7 }
 0x277   : > { %p1058_p10 = por %p1057_p2, %p1056_p4 }
 0x278   : > { %p1054_p3 = pneg %p1053_p1 }
 0x279   : > { %p1060_p9 = por %p1059_p5, %p1058_p10 }
 0x27b   : > { %p1061_p6 = pnand %p1060_p9, %p1054_p3 }
 0x27d   : > { %1064 = shalt.err (!%p1061_p6)
}
 0x27e   : > { %887 = dma.vmem_to_hbm [thread:$0]  (%p1470_p7), %s664_s10, 64, %s1390_s15, %s646_s11   ;;  %vm643_vm10 = vcmask 1024  }
 0x27f   : > { %s854_s12 = sshll.u32 %s1350_s24, 1 }
 0x280   : > { %s461_s13 = scalar_lea.vmem %s1440_s8, %s854_s12 }
 0x2fe   : > { %v642_v7 = vpop.xlane.xlu0 %641 }
 0x2ff   : > { %644 = vst.msk [vmem:[%s461_s13] sm:$0x3] %vm643_vm10, %v642_v7 }
 0x300 PF: > { %s1471_s29 = sld [smem:[#allocation15_spill]]  ;;  %s678_s18 = sand.u32 1, %s1095_s27  }
 0x301   : > { %p1473_p0 = scmp.ge.s32.totalorder %s1107_s30, 2  ;;  %s679_s16 = scalar_lea.sflag [#allocation4], %s678_s18 }
 0x306   : > { %p1472_p12 = scmp.ne.s32.totalorder %s1471_s29, 0 }
 0x308   : > { %p900_p8 = pnand %p1473_p0, %p1472_p12 }
 0x30a   : > { %1090 = dma.done.wait (!%p900_p8), %s679_s16, 64  }
 0x30b   : > { %1092 = vsyncadd (!%p900_p8), %s679_s16, 4294967232  ;;  %s1474_s30 = sld [smem:[#allocation13_spill]]  ;;  %s1475_s24 = sld [smem:[#allocation12_spill]] }
 0x30c   : > { %s1476_s29 = sld [smem:[#allocation14_spill]]  ;;  %s1477_s27 = smov %s1099_s28 }
 0x311   : > { %p25_p7 = scmp.ge.s32.totalorder %s1474_s30, 4   ;;  %s1478_s28 = smov %s1475_s24 }
 0x313   :  { %27 = sbr.rel (!%p25_p7) target bundleno = 9 (0x9), region = 141 }
 0x31a   :  { %691 = vsyncpa [#allocation3], 1 }
 0x31b   :  { %693 = vsyncpa [#allocation3 + $0x1], 1 }
 0x31c   :  { %694 = vsyncpa [#allocation6], 1 }
 0x31d   :  { %696 = vsyncpa [#allocation6 + $0x1], 1 }
 0x31e   :  { %697 = vsyncpa [#allocation4], 1 }
 0x31f   :  { %699 = vsyncpa [#allocation4 + $0x1], 1 }

</bundles_post_ra>
